<compile_context>
chip_gen: v5e
topology: v5e:2x2
jax: 0.10.0
libtpu: 0.0.40
codegen_flags: <defaults>
</compile_context>

<pallas_src>
import math

import jax
import jax.numpy as jnp
from jax.experimental import pallas as pl
from jax.experimental.pallas import tpu as pltpu

NORM_CONST = 0.5
SQRT_NORM = math.sqrt(NORM_CONST)
NEG_BIG = -1e30          # finite mask sentinel (NaN-safe)
LANE = 128


def _cdiv(a, b):
    return -(-a // b)


def _round_up(n, m):
    return _cdiv(n, m) * m


def _pad_axis(a, axis, new_size):
    pad = new_size - a.shape[axis]
    if pad <= 0:
        return a
    widths = [(0, 0)] * a.ndim
    widths[axis] = (0, pad)
    return jnp.pad(a, widths)


def _chip_traits():
    """(wide 256-MXU / bf16-EUP chip?, per-core VMEM bytes) with safe fallbacks."""
    vmem_cap = 64 * 1024 * 1024          # v7x per-core size: conservative everywhere
    try:
        vmem_cap = int(pltpu.get_tpu_info().vmem_capacity_bytes)
    except Exception:
        pass
    newer = False
    try:
        kind = jax.devices()[0].device_kind.lower()
        newer = ("v6" in kind) or ("v7" in kind)
    except Exception:
        pass
    return newer, vmem_cap


def _lane_round(d, prefer_256):
    """Round a lane-facing dim: keep as-is if already 128-dense, else pad to 128;
    bump to a 256 multiple on v6e/v7x only when nearly free (<= 12.5% extra)."""
    dp = d if d % LANE == 0 else _round_up(d, LANE)
    if prefer_256 and dp % 256 != 0:
        cand = _round_up(dp, 256)
        if cand - d <= d // 8:
            dp = cand
    return dp


def _make_kernel(exp_dtype, need_attn):
    def kernel(scale_ref,      # SMEM (B,)  f32 : s * rsqrt(s) per batch
               x_ref,          # (tT, Cp)   bf16
               tgt_ref,        # (tT, Ep)   bf16
               enc_a_ref,      # (Ep, Sp)   bf16  encoder keys (pre-transposed)
               enc_b_ref,      # (Sp, Ep)   bf16  encoder values
               bias_ref,       # (1, Sp)    f32   additive padding bias
               w_in_t_ref,     # (Cp, Ep)   bf16
               b_in_ref,       # (1, Ep)    f32
               w_out_t_ref,    # (Ep, Cp)   bf16
               b_out_ref,      # (1, Cp)    f32
               *out_refs):     # out (tT, Cp) [, attn (tT, Sp) bf16]
        if need_attn:
            out_ref, attn_ref = out_refs
        else:
            (out_ref,) = out_refs

        b = pl.program_id(0)
        s_scale = scale_ref[b]                                  # scalar from SMEM

        # in_projection(x) + target_embedding, scaled by sqrt(0.5)   (f32 accum)
        h = jnp.dot(x_ref[...], w_in_t_ref[...], preferred_element_type=jnp.float32)
        h = (h + b_in_ref[...] + tgt_ref[...].astype(jnp.float32)) * SQRT_NORM

        # attention scores + additive padding bias (finite -1e30 sentinel)
        scores = jnp.dot(h.astype(jnp.bfloat16), enc_a_ref[...],
                         preferred_element_type=jnp.float32)    # (tT, Sp)
        scores = scores + bias_ref[...]

        # softmax over the source dim; exp in bf16 on v6e/v7x (bf16 EUP),
        # row-sum + reciprocal kept in f32; divide on the EUP.
        m = jnp.max(scores, axis=-1, keepdims=True)
        p = jnp.exp((scores - m).astype(exp_dtype)).astype(jnp.float32)
        l = jnp.sum(p, axis=-1, keepdims=True)
        attn = p * pl.reciprocal(l, approx=True)
        attn_bf = attn.astype(jnp.bfloat16)
        if need_attn:
            attn_ref[...] = attn_bf                             # bf16 writeback

        # context + out_projection; per-batch scalar length scale folded into the
        # (tT, Cp) epilogue (mathematically identical to scaling ctx, but cheaper).
        ctx = jnp.dot(attn_bf, enc_b_ref[...], preferred_element_type=jnp.float32)
        out = jnp.dot(ctx.astype(jnp.bfloat16), w_out_t_ref[...],
                      preferred_element_type=jnp.float32)
        out_ref[...] = (out * s_scale + b_out_ref[...]).astype(out_ref.dtype)

    return kernel


def attention_layer(x, target_embedding, enc_a, enc_b, padding_mask,
                    w_in, b_in, w_out, b_out, *,
                    t_tile=256, out_dtype=jnp.bfloat16, need_attn=True):
    B, T, C = x.shape
    E = w_in.shape[0]
    S = enc_a.shape[-1]
    f32, bf = jnp.float32, jnp.bfloat16

    wide_mxu, vmem_cap = _chip_traits()
    exp_dtype = bf if wide_mxu else f32            # bf16 EUP only on v6e/v7x

    # Lane-dense rounding (no-op when dims are already 128-multiples).
    Cp = _lane_round(C, False)
    Ep = _lane_round(E, wide_mxu)
    Sp = _lane_round(S, wide_mxu)

    # T tiling: never padded in HBM; tile is the full T (always legal) or a
    # multiple of 16 (bf16 sublane packing), ragged last tile handled by Pallas.
    t_tile = max(16, _round_up(int(t_tile), 16))
    tT = T if T <= t_tile else t_tile

    # ---- VMEM budget (generation aware) -------------------------------------
    out_bytes = jnp.dtype(out_dtype).itemsize
    vmem_budget = max(32 << 20, min((vmem_cap * 3) // 4, 96 << 20))

    def footprint(tt, kv_bufs):
        stream = 2 * (tt * Cp * 2 + tt * Ep * 2 + tt * Cp * out_bytes
                      + (tt * Sp * 2 if need_attn else 0))       # double-buffered
        per_batch = kv_bufs * (Ep * Sp * 2 + Sp * Ep * 2 + Sp * 4)
        weights = 2 * (Cp * Ep * 2 + Ep * Cp * 2 + Ep * 4 + Cp * 4)
        live = 4 * tt * (2 * Sp + 2 * Ep + Cp)                   # f32 intermediates
        return stream + per_batch + weights + live

    kv_bufs = 2
    while footprint(tT, kv_bufs) > vmem_budget:
        new_tT = max(16, _round_up(max(tT // 2, 1), 16))
        if new_tT >= tT:
            break
        tT = new_tT
    if footprint(tT, kv_bufs) > vmem_budget:
        kv_bufs = 1        # single-buffer K/V + weights (they never change over t)

    n_t = _cdiv(T, tT)
    if B * n_t < 2 and T >= 32:
        # Keep both v7x TensorCores busy when B==1 and T fits in one tile.
        tT = _round_up(_cdiv(T, 2), 16)
        n_t = _cdiv(T, tT)

    vmem_limit = int(min(vmem_budget, max(32 << 20, 2 * footprint(tT, kv_bufs))))

    # ---- operand preparation (bf16 matmul operands, f32 accumulation in-kernel)
    x_p   = _pad_axis(x.astype(bf), 2, Cp)
    tgt_p = _pad_axis(target_embedding.astype(bf), 2, Ep)
    ka_p  = _pad_axis(_pad_axis(enc_a.astype(bf), 1, Ep), 2, Sp)
    kv_p  = _pad_axis(_pad_axis(enc_b.astype(bf), 1, Sp), 2, Ep)

    w_in_t  = _pad_axis(_pad_axis(w_in.T.astype(bf), 0, Cp), 1, Ep)    # (Cp, Ep)
    b_in_p  = _pad_axis(b_in.astype(f32).reshape(1, E), 1, Ep)         # (1, Ep)
    w_out_t = _pad_axis(_pad_axis(w_out.T.astype(bf), 0, Ep), 1, Cp)   # (Ep, Cp)
    b_out_p = _pad_axis(b_out.astype(f32).reshape(1, C), 1, Cp)        # (1, Cp)

    # Additive mask: -1e30 at real padded positions and at artificial S padding.
    pad_f = padding_mask.astype(f32)                                   # (B, S)
    bias = jnp.where(padding_mask, jnp.float32(NEG_BIG), jnp.float32(0.0))
    if Sp != S:
        bias = jnp.pad(bias, ((0, 0), (0, Sp - S)), constant_values=NEG_BIG)
    bias = bias.reshape(B, 1, Sp).astype(f32)

    # Per-batch context scale  s * rsqrt(s)  (== sqrt(#unpadded source tokens)).
    s_eff = jnp.float32(S) - jnp.sum(pad_f, axis=1)                    # (B,)
    s_eff = jnp.maximum(s_eff, 1.0)   # NaN guard for fully-padded batches
    scale = (s_eff * jax.lax.rsqrt(s_eff)).astype(f32)

    # ---- specs ---------------------------------------------------------------
    # K/V, bias and weights are constant over the inner t axis (Pallas skips their
    # re-DMA across T tiles); single-buffer them only when VMEM is tight (v7x).
    const_kwargs = dict(pipeline_mode=pl.Buffered(1)) if kv_bufs == 1 else {}

    in_specs = [
        pl.BlockSpec(memory_space=pltpu.MemorySpace.SMEM),              # scale (B,)
        pl.BlockSpec((None, tT, Cp), lambda b, t: (b, t, 0)),           # x
        pl.BlockSpec((None, tT, Ep), lambda b, t: (b, t, 0)),           # target_emb
        pl.BlockSpec((None, Ep, Sp), lambda b, t: (b, 0, 0), **const_kwargs),  # keys
        pl.BlockSpec((None, Sp, Ep), lambda b, t: (b, 0, 0), **const_kwargs),  # values
        pl.BlockSpec((None, 1, Sp), lambda b, t: (b, 0, 0), **const_kwargs),   # bias
        pl.BlockSpec((Cp, Ep), lambda b, t: (0, 0), **const_kwargs),    # w_in^T
        pl.BlockSpec((1, Ep), lambda b, t: (0, 0), **const_kwargs),     # b_in
        pl.BlockSpec((Ep, Cp), lambda b, t: (0, 0), **const_kwargs),    # w_out^T
        pl.BlockSpec((1, Cp), lambda b, t: (0, 0), **const_kwargs),     # b_out
    ]

    out_shapes = [jax.ShapeDtypeStruct((B, T, Cp), out_dtype)]
    out_specs = [pl.BlockSpec((None, tT, Cp), lambda b, t: (b, t, 0))]
    if need_attn:
        out_shapes.append(jax.ShapeDtypeStruct((B, T, Sp), bf))
        out_specs.append(pl.BlockSpec((None, tT, Sp), lambda b, t: (b, t, 0)))

    # Grid order must stay (B outer, T-tiles inner): K/V + weight index_maps are
    # constant over the inner axis, so they are fetched once per batch.
    results = pl.pallas_call(
        _make_kernel(exp_dtype, need_attn),
        out_shape=tuple(out_shapes),
        grid=(B, n_t),
        in_specs=in_specs,
        out_specs=tuple(out_specs),
        compiler_params=pltpu.CompilerParams(
            dimension_semantics=("parallel", "parallel"),
            vmem_limit_bytes=vmem_limit),
    )(scale, x_p, tgt_p, ka_p, kv_p, bias, w_in_t, b_in_p, w_out_t, b_out_p)

    if need_attn:
        out_p, attn_p = results
    else:
        (out_p,) = results
        attn_p = None

    # Slice lane padding back off ONLY when padding actually happened.
    out = out_p if Cp == C else out_p[..., :C]
    if need_attn:
        attn = attn_p if Sp == S else attn_p[..., :S]
        return out, attn
    return out, None


def ref_forward(x, tgt, enc_a, enc_b, padding_mask, w_in, b_in, w_out, b_out):
    """Pure-JAX reference following the PyTorch forward, with the same bf16-operand /
    f32-accumulation mixed precision as the kernel (scalar length scale applied after
    the out projection — identical in exact arithmetic)."""
    bf, f32 = jnp.bfloat16, jnp.float32
    h = jnp.einsum('btc,ec->bte', x.astype(bf), w_in.astype(bf),
                   preferred_element_type=f32)
    h = (h + b_in.astype(f32) + tgt.astype(bf).astype(f32)) * SQRT_NORM
    scores = jnp.einsum('bte,bes->bts', h.astype(bf), enc_a.astype(bf),
                        preferred_element_type=f32)
    scores = jnp.where(padding_mask[:, None, :], -jnp.inf, scores)
    attn = jax.nn.softmax(scores, axis=-1)
    ctx = jnp.einsum('bts,bse->bte', attn.astype(bf), enc_b.astype(bf),
                     preferred_element_type=f32)
    s = jnp.float32(enc_b.shape[1]) - padding_mask.astype(f32).sum(axis=1)    # (B,)
    scale = (s * jax.lax.rsqrt(s))[:, None, None]
    out = jnp.einsum('bte,ce->btc', ctx.astype(bf), w_out.astype(bf),
                     preferred_element_type=f32) * scale + b_out.astype(f32)
    return out, attn


def make_weight_norm_linear(key, in_features, out_features, dropout=0.0):
    """Replicates fairseq's weight-normalized Linear init: w = g * v/||v||, g=||v||."""
    v = jax.random.normal(key, (out_features, in_features), jnp.float32)
    v = v * math.sqrt((1.0 - dropout) / in_features)
    norm = jnp.sqrt(jnp.sum(v * v, axis=1, keepdims=True))
    g = norm
    w = g * v / norm            # == v at init (kept explicit for fidelity)
    b = jnp.zeros((out_features,), jnp.float32)
    return w, b


if __name__ == "__main__":
    B, T, S = 2, 8, 8          # batch, target len, source len
    C, E = 4, 32               # conv_channels, embed_dim

    key = jax.random.PRNGKey(0)
    k_win, k_wout, kx, kt, ka, kb = jax.random.split(key, 6)

    w_in, b_in = make_weight_norm_linear(k_win, C, E)     # in_projection:  C -> E
    w_out, b_out = make_weight_norm_linear(k_wout, E, C)  # out_projection: E -> C

    x = jax.random.normal(kx, (B, T, C), jnp.float32)
    target_embedding = jax.random.normal(kt, (B, T, E), jnp.float32)
    enc_a = jax.random.normal(ka, (B, E, S), jnp.float32)   # encoder_out[0]
    enc_b = jax.random.normal(kb, (B, S, E), jnp.float32)   # encoder_out[1]

    # padding mask: batch 1 has its last two source positions padded
    padding_mask = jnp.zeros((B, S), dtype=bool).at[1, -2:].set(True)

    out, attn = attention_layer(x, target_embedding, enc_a, enc_b, padding_mask,
                                w_in, b_in, w_out, b_out)
    out = jax.block_until_ready(out)
    attn = jax.block_until_ready(attn)

    out_r, attn_r = ref_forward(x, target_embedding, enc_a, enc_b, padding_mask,
                                w_in, b_in, w_out, b_out)

    assert out.shape == (B, T, C) and attn.shape == (B, T, S)
    assert jnp.allclose(out.astype(jnp.float32), out_r, rtol=2e-2, atol=2e-2), \
        "output mismatch"
    assert jnp.allclose(attn.astype(jnp.float32), attn_r, rtol=2e-2, atol=2e-2), \
        "attn mismatch"

    # attn-free variant (drops the B*T*S writeback entirely when attn is unused)
    out2, _ = attention_layer(x, target_embedding, enc_a, enc_b, padding_mask,
                              w_in, b_in, w_out, b_out, need_attn=False)
    out2 = jax.block_until_ready(out2)
    assert out2.shape == (B, T, C)
    assert jnp.allclose(out2.astype(jnp.float32), out_r, rtol=2e-2, atol=2e-2), \
        "need_attn=False output mismatch"

    print("KERNEL_OK")
</pallas_src>

<mosaic_0001>
module attributes {stable_mosaic.version = 11 : i64} {
  func.func @kernel(%arg0: i32, %arg1: i32, %arg2: memref<2xf32, #tpu.memory_space<smem>>, %arg3: memref<1x8x128xbf16, #tpu.memory_space<vmem>>, %arg4: memref<1x8x128xbf16, #tpu.memory_space<vmem>>, %arg5: memref<1x128x128xbf16, #tpu.memory_space<vmem>>, %arg6: memref<1x128x128xbf16, #tpu.memory_space<vmem>>, %arg7: memref<1x1x128xf32, #tpu.memory_space<vmem>>, %arg8: memref<128x128xbf16, #tpu.memory_space<vmem>>, %arg9: memref<1x128xf32, #tpu.memory_space<vmem>>, %arg10: memref<128x128xbf16, #tpu.memory_space<vmem>>, %arg11: memref<1x128xf32, #tpu.memory_space<vmem>>, %arg12: memref<1x8x128xbf16, #tpu.memory_space<vmem>>, %arg13: memref<1x8x128xbf16, #tpu.memory_space<vmem>>) attributes {dimension_semantics = [#tpu.dimension_semantics<parallel>, #tpu.dimension_semantics<parallel>], iteration_bounds = array<i64: 2, 1>, scalar_prefetch = 0 : i64, scratch_operands = 0 : i64, tpu.core_type = #tpu.core_type<tc>, window_params = [{transform_indices = @transform_0, window_bounds = array<i64: 2>}, {transform_indices = @transform_1, window_bounds = array<i64: 1, 8, 128>}, {transform_indices = @transform_2, window_bounds = array<i64: 1, 8, 128>}, {transform_indices = @transform_3, window_bounds = array<i64: 1, 128, 128>}, {transform_indices = @transform_4, window_bounds = array<i64: 1, 128, 128>}, {transform_indices = @transform_5, window_bounds = array<i64: 1, 1, 128>}, {pipeline_mode = #tpu.pipeline_mode<synchronous>, transform_indices = @transform_6, window_bounds = array<i64: 128, 128>}, {pipeline_mode = #tpu.pipeline_mode<synchronous>, transform_indices = @transform_7, window_bounds = array<i64: 1, 128>}, {pipeline_mode = #tpu.pipeline_mode<synchronous>, transform_indices = @transform_8, window_bounds = array<i64: 128, 128>}, {pipeline_mode = #tpu.pipeline_mode<synchronous>, transform_indices = @transform_9, window_bounds = array<i64: 1, 128>}, {transform_indices = @transform_10, window_bounds = array<i64: 1, 8, 128>}, {transform_indices = @transform_11, window_bounds = array<i64: 1, 8, 128>}]} {
    %0 = arith.index_cast %arg0 : i32 to index
    %1 = memref.load %arg2[%0] : memref<2xf32, #tpu.memory_space<smem>>
    %c0 = arith.constant 0 : index
    %c0_0 = arith.constant 0 : index
    %c0_1 = arith.constant 0 : index
    %2 = vector.load %arg3[%c0, %c0_0, %c0_1] : memref<1x8x128xbf16, #tpu.memory_space<vmem>>, vector<1x8x128xbf16>
    %3 = vector.shape_cast %2 : vector<1x8x128xbf16> to vector<8x128xbf16>
    %c0_2 = arith.constant 0 : index
    %c0_3 = arith.constant 0 : index
    %4 = vector.load %arg8[%c0_2, %c0_3] : memref<128x128xbf16, #tpu.memory_space<vmem>>, vector<128x128xbf16>
    %cst = arith.constant dense<0.000000e+00> : vector<8x128xf32>
    %5 = tpu.matmul %3, %4, %cst {dimension_numbers = #tpu.dot_dimension_numbers<[1], [0], [0], [1], [0, 0, 1, 1], [], []>} : vector<8x128xbf16>, vector<128x128xbf16>, vector<8x128xf32> -> vector<8x128xf32>
    %c0_4 = arith.constant 0 : index
    %c0_5 = arith.constant 0 : index
    %6 = vector.load %arg9[%c0_4, %c0_5] : memref<1x128xf32, #tpu.memory_space<vmem>>, vector<1x128xf32>
    %7 = vector.broadcast %6 : vector<1x128xf32> to vector<8x128xf32>
    %8 = arith.addf %5, %7 : vector<8x128xf32>
    %c0_6 = arith.constant 0 : index
    %c0_7 = arith.constant 0 : index
    %c0_8 = arith.constant 0 : index
    %9 = vector.load %arg4[%c0_6, %c0_7, %c0_8] : memref<1x8x128xbf16, #tpu.memory_space<vmem>>, vector<1x8x128xbf16>
    %10 = vector.shape_cast %9 : vector<1x8x128xbf16> to vector<8x128xbf16>
    %11 = arith.extf %10 : vector<8x128xbf16> to vector<8x128xf32>
    %12 = arith.addf %8, %11 : vector<8x128xf32>
    %cst_9 = arith.constant 0.707106769 : f32
    %13 = vector.broadcast %cst_9 : f32 to vector<8x128xf32>
    %14 = arith.mulf %12, %13 : vector<8x128xf32>
    %15 = arith.truncf %14 : vector<8x128xf32> to vector<8x128xbf16>
    %c0_10 = arith.constant 0 : index
    %c0_11 = arith.constant 0 : index
    %c0_12 = arith.constant 0 : index
    %16 = vector.load %arg5[%c0_10, %c0_11, %c0_12] : memref<1x128x128xbf16, #tpu.memory_space<vmem>>, vector<1x128x128xbf16>
    %17 = vector.shape_cast %16 : vector<1x128x128xbf16> to vector<128x128xbf16>
    %cst_13 = arith.constant dense<0.000000e+00> : vector<8x128xf32>
    %18 = tpu.matmul %15, %17, %cst_13 {dimension_numbers = #tpu.dot_dimension_numbers<[1], [0], [0], [1], [0, 0, 1, 1], [], []>} : vector<8x128xbf16>, vector<128x128xbf16>, vector<8x128xf32> -> vector<8x128xf32>
    %c0_14 = arith.constant 0 : index
    %c0_15 = arith.constant 0 : index
    %c0_16 = arith.constant 0 : index
    %19 = vector.load %arg7[%c0_14, %c0_15, %c0_16] : memref<1x1x128xf32, #tpu.memory_space<vmem>>, vector<1x1x128xf32>
    %20 = vector.shape_cast %19 : vector<1x1x128xf32> to vector<1x128xf32>
    %21 = vector.broadcast %20 : vector<1x128xf32> to vector<8x128xf32>
    %22 = arith.addf %18, %21 : vector<8x128xf32>
    %cst_17 = arith.constant dense<0xFF800000> : vector<8xf32>
    %23 = vector.multi_reduction <maximumf>, %22, %cst_17 [1] : vector<8x128xf32> to vector<8xf32>
    %24 = vector.shape_cast %23 : vector<8xf32> to vector<8x1xf32>
    %25 = vector.broadcast %24 : vector<8x1xf32> to vector<8x128xf32>
    %26 = arith.subf %22, %25 : vector<8x128xf32>
    %27 = math.exp %26 : vector<8x128xf32>
    %cst_18 = arith.constant dense<0.000000e+00> : vector<8xf32>
    %28 = vector.multi_reduction <add>, %27, %cst_18 [1] : vector<8x128xf32> to vector<8xf32>
    %29 = vector.shape_cast %28 : vector<8xf32> to vector<8x1xf32>
    %30 = tpu.reciprocal %29 {approx = true} : vector<8x1xf32> -> vector<8x1xf32>
    %31 = vector.broadcast %30 : vector<8x1xf32> to vector<8x128xf32>
    %32 = arith.mulf %27, %31 : vector<8x128xf32>
    %33 = arith.truncf %32 : vector<8x128xf32> to vector<8x128xbf16>
    %c0_19 = arith.constant 0 : index
    %c0_20 = arith.constant 0 : index
    %c0_21 = arith.constant 0 : index
    %34 = vector.load %arg13[%c0_19, %c0_20, %c0_21] : memref<1x8x128xbf16, #tpu.memory_space<vmem>>, vector<1x8x128xbf16>
    %35 = vector.shape_cast %34 : vector<1x8x128xbf16> to vector<8x128xbf16>
    %36 = vector.shape_cast %33 : vector<8x128xbf16> to vector<1x8x128xbf16>
    tpu.vector_store %arg13[%c0_19, %c0_20, %c0_21], %36 {strides = array<i32>} : memref<1x8x128xbf16, #tpu.memory_space<vmem>>, vector<1x8x128xbf16>,
    %c0_22 = arith.constant 0 : index
    %c0_23 = arith.constant 0 : index
    %c0_24 = arith.constant 0 : index
    %37 = vector.load %arg6[%c0_22, %c0_23, %c0_24] : memref<1x128x128xbf16, #tpu.memory_space<vmem>>, vector<1x128x128xbf16>
    %38 = vector.shape_cast %37 : vector<1x128x128xbf16> to vector<128x128xbf16>
    %cst_25 = arith.constant dense<0.000000e+00> : vector<8x128xf32>
    %39 = tpu.matmul %33, %38, %cst_25 {dimension_numbers = #tpu.dot_dimension_numbers<[1], [0], [0], [1], [0, 0, 1, 1], [], []>} : vector<8x128xbf16>, vector<128x128xbf16>, vector<8x128xf32> -> vector<8x128xf32>
    %40 = arith.truncf %39 : vector<8x128xf32> to vector<8x128xbf16>
    %c0_26 = arith.constant 0 : index
    %c0_27 = arith.constant 0 : index
    %41 = vector.load %arg10[%c0_26, %c0_27] : memref<128x128xbf16, #tpu.memory_space<vmem>>, vector<128x128xbf16>
    %cst_28 = arith.constant dense<0.000000e+00> : vector<8x128xf32>
    %42 = tpu.matmul %40, %41, %cst_28 {dimension_numbers = #tpu.dot_dimension_numbers<[1], [0], [0], [1], [0, 0, 1, 1], [], []>} : vector<8x128xbf16>, vector<128x128xbf16>, vector<8x128xf32> -> vector<8x128xf32>
    %43 = vector.broadcast %1 : f32 to vector<8x128xf32>
    %44 = arith.mulf %42, %43 : vector<8x128xf32>
    %c0_29 = arith.constant 0 : index
    %c0_30 = arith.constant 0 : index
    %45 = vector.load %arg11[%c0_29, %c0_30] : memref<1x128xf32, #tpu.memory_space<vmem>>, vector<1x128xf32>
    %46 = vector.broadcast %45 : vector<1x128xf32> to vector<8x128xf32>
    %47 = arith.addf %44, %46 : vector<8x128xf32>
    %48 = arith.truncf %47 : vector<8x128xf32> to vector<8x128xbf16>
    %c0_31 = arith.constant 0 : index
    %c0_32 = arith.constant 0 : index
    %c0_33 = arith.constant 0 : index
    %49 = vector.load %arg12[%c0_31, %c0_32, %c0_33] : memref<1x8x128xbf16, #tpu.memory_space<vmem>>, vector<1x8x128xbf16>
    %50 = vector.shape_cast %49 : vector<1x8x128xbf16> to vector<8x128xbf16>
    %51 = vector.shape_cast %48 : vector<8x128xbf16> to vector<1x8x128xbf16>
    tpu.vector_store %arg12[%c0_31, %c0_32, %c0_33], %51 {strides = array<i32>} : memref<1x8x128xbf16, #tpu.memory_space<vmem>>, vector<1x8x128xbf16>,
    return
  }
  func.func @transform_0(%arg0: i32, %arg1: i32) -> i32 {
    %c0_i32 = arith.constant 0 : i32
    %c0_i32_0 = arith.constant 0 : i32
    return %c0_i32 : i32
  }
  func.func @transform_1(%arg0: i32, %arg1: i32) -> (i32, i32, i32) {
    %c0_i32 = arith.constant 0 : i32
    %c0_i32_0 = arith.constant 0 : i32
    return %arg0, %arg1, %c0_i32 : i32, i32, i32
  }
  func.func @transform_2(%arg0: i32, %arg1: i32) -> (i32, i32, i32) {
    %c0_i32 = arith.constant 0 : i32
    %c0_i32_0 = arith.constant 0 : i32
    return %arg0, %arg1, %c0_i32 : i32, i32, i32
  }
  func.func @transform_3(%arg0: i32, %arg1: i32) -> (i32, i32, i32) {
    %c0_i32 = arith.constant 0 : i32
    %c0_i32_0 = arith.constant 0 : i32
    %c0_i32_1 = arith.constant 0 : i32
    return %arg0, %c0_i32, %c0_i32_0 : i32, i32, i32
  }
  func.func @transform_4(%arg0: i32, %arg1: i32) -> (i32, i32, i32) {
    %c0_i32 = arith.constant 0 : i32
    %c0_i32_0 = arith.constant 0 : i32
    %c0_i32_1 = arith.constant 0 : i32
    return %arg0, %c0_i32, %c0_i32_0 : i32, i32, i32
  }
  func.func @transform_5(%arg0: i32, %arg1: i32) -> (i32, i32, i32) {
    %c0_i32 = arith.constant 0 : i32
    %c0_i32_0 = arith.constant 0 : i32
    %c0_i32_1 = arith.constant 0 : i32
    return %arg0, %c0_i32, %c0_i32_0 : i32, i32, i32
  }
  func.func @transform_6(%arg0: i32, %arg1: i32) -> (i32, i32) {
    %c0_i32 = arith.constant 0 : i32
    %c0_i32_0 = arith.constant 0 : i32
    %c0_i32_1 = arith.constant 0 : i32
    return %c0_i32, %c0_i32_0 : i32, i32
  }
  func.func @transform_7(%arg0: i32, %arg1: i32) -> (i32, i32) {
    %c0_i32 = arith.constant 0 : i32
    %c0_i32_0 = arith.constant 0 : i32
    %c0_i32_1 = arith.constant 0 : i32
    return %c0_i32, %c0_i32_0 : i32, i32
  }
  func.func @transform_8(%arg0: i32, %arg1: i32) -> (i32, i32) {
    %c0_i32 = arith.constant 0 : i32
    %c0_i32_0 = arith.constant 0 : i32
    %c0_i32_1 = arith.constant 0 : i32
    return %c0_i32, %c0_i32_0 : i32, i32
  }
  func.func @transform_9(%arg0: i32, %arg1: i32) -> (i32, i32) {
    %c0_i32 = arith.constant 0 : i32
    %c0_i32_0 = arith.constant 0 : i32
    %c0_i32_1 = arith.constant 0 : i32
    return %c0_i32, %c0_i32_0 : i32, i32
  }
  func.func @transform_10(%arg0: i32, %arg1: i32) -> (i32, i32, i32) {
    %c0_i32 = arith.constant 0 : i32
    %c0_i32_0 = arith.constant 0 : i32
    return %arg0, %arg1, %c0_i32 : i32, i32, i32
  }
  func.func @transform_11(%arg0: i32, %arg1: i32) -> (i32, i32, i32) {
    %c0_i32 = arith.constant 0 : i32
    %c0_i32_0 = arith.constant 0 : i32
    return %arg0, %arg1, %c0_i32 : i32, i32, i32
  }
}

</mosaic_0001>

<bundles_post_ra>
// kernel: tpu_custom_call.1
= control target key start
LH: loop header
LB: loop body
LE: loop exit
PB: predicated region body
PF: predicated region fallthrough
CT: control target
= control target key end

     0   :  { %s2224_s0 = inlined_call_operand.hbm [shape: f32[2], index: 0, kind: input, shape index: {}]   ;;  %s2225_s1 = inlined_call_operand.hbm [shape: bf16[2,8,128], index: 1, kind: input, shape index: {}]   ;;  %s2226_s2 = inlined_call_operand.hbm [shape: bf16[2,8,128], index: 2, kind: input, shape index: {}]   ;;  %s2227_s3 = inlined_call_operand.hbm [shape: bf16[2,128,128], index: 3, kind: input, shape index: {}]   ;;  %s2228_s4 = inlined_call_operand.hbm [shape: bf16[2,128,128], index: 4, kind: input, shape index: {}]   ;;  %s2229_s5 = inlined_call_operand.vmem [shape: f32[2,1,128], index: 5, kind: input, shape index: {}]   ;;  %s2230_s6 = inlined_call_operand.hbm [shape: bf16[128,128], index: 6, kind: input, shape index: {}]   ;;  %s2231_s7 = inlined_call_operand.vmem [shape: f32[1,128], index: 7, kind: input, shape index: {}]   ;;  %s2232_s8 = inlined_call_operand.hbm [shape: bf16[128,128], index: 8, kind: input, shape index: {}]   ;;  %s2233_s9 = inlined_call_operand.vmem [shape: f32[1,128], index: 9, kind: input, shape index: {}]   ;;  %s2234_s10 = inlined_call_operand.hbm [shape: bf16[2,8,128], index: 10, kind: output, shape index: {0}]   ;;  %s2235_s11 = inlined_call_operand.hbm [shape: bf16[2,8,128], index: 11, kind: output, shape index: {1}]  }
   0x1   :  { %2252 = sst [smem:[#allocation33_spill]] %s2224_s0 }
   0x2   :  { %2253 = sst [smem:[#allocation34_spill]] %s2226_s2 }
   0x3   :  { %2254 = sst [smem:[#allocation35_spill]] %s2229_s5 }
   0x4   :  { %2255 = sst [smem:[#allocation36_spill]] %s2230_s6 }
   0x5   :  { %2256 = sst [smem:[#allocation37_spill]] %s2231_s7 }
   0x6   :  { %2257 = sst [smem:[#allocation38_spill]] %s2232_s8 }
   0x7   :  { %2258 = sst [smem:[#allocation39_spill]] %s2233_s9 }
   0x8   :  { %2259 = sst [smem:[#allocation40_spill]] %s2234_s10 }
   0x9   :  { %2260 = sst [smem:[#allocation41_spill]] %s2235_s11 }
   0xa   :  { %17 = vsyncpa [#allocation5], 0 }
   0xb   :  { %18 = vsyncpa [#allocation3], 0 }
   0xc   :  { %20 = vsyncpa [#allocation3 + $0x1], 0 }
   0xd   :  { %21 = vsyncpa [#allocation8], 0 }
   0xe   :  { %23 = vsyncpa [#allocation8 + $0x1], 0 }
   0xf   :  { %24 = vsyncpa [#allocation11], 0 }
  0x10   :  { %26 = vsyncpa [#allocation11 + $0x1], 0 }
  0x11   :  { %27 = vsyncpa [#allocation14], 0 }
  0x12   :  { %28 = vsyncpa [#allocation4], 0 }
  0x13   :  { %30 = vsyncpa [#allocation4 + $0x1], 0 }
  0x14   :  { %31 = vsyncpa [#allocation17], 0 }
  0x15   :  { %33 = vsyncpa [#allocation17 + $0x1], 0  ;;  %s1933_s17 = smov 0   ;;  %s1935_s18 = smov 0  }
  0x16   :  { %s1937_s19 = smov 0   ;;  %s1939_s20 = smov 0  }
  0x17   :  { %s1941_s21 = smov 0   ;;  %s1943_s22 = smov 0  }
  0x18 LB: > { %2261 = sst [smem:[#allocation26_spill]] %s1846_s17  ;;  %s1964_s23 = sadd.s32 4294967295, %s1866_s22   ;;  %s1866_s22 = sphi %s1943_s22, %s39_s22   ;;  %s1862_s21 = sphi %s1941_s21, %s2294_s21   ;;  %s1858_s20 = sphi %s1939_s20, %s2293_s20   ;;  %s1854_s19 = sphi %s1937_s19, %s2292_s19   ;;  %s1850_s18 = sphi %s1935_s18, %s2296_s18   ;;  %s1846_s17 = sphi %s1933_s17, %s2295_s17  }
  0x19   : > { %2262 = sst [smem:[#allocation27_spill]] %s1854_s19  ;;  %s1221_s24 = sadd.s32 4294967294, %s1866_s22  }
  0x1a   : > { %2263 = sst [smem:[#allocation28_spill]] %s1862_s21  ;;  %p94_p0 = scmp.ne.s32.totalorder %s1850_s18, %s1846_s17 }
  0x1b   : > { %p95_p1 = scmp.eq.s32.totalorder %s1964_s23, 0  ;;  %p310_p2 = scmp.eq.s32.totalorder %s1964_s23, 1 }
  0x1c   : > { %p316_p3 = scmp.eq.s32.totalorder %s1221_s24, 1  ;;  %p1222_p5 = scmp.ge.s32.totalorder %s1866_s22, 1 }
  0x1d   : > { %p1973_p4 = por %p95_p1, %p94_p0  ;;  %p351_p7 = scmp.lt.s32.totalorder %s1866_s22, 3 }
  0x1e   : > { %p1978_p6 = por %p316_p3, %p94_p0  ;;  %s2267_s6 = sld [smem:[#allocation36_spill]] }
  0x1f   : > { %p1986_p8 = pnand %p1222_p5, %p351_p7  ;;  %s1868_s12 = smov [#allocation12]  }
  0x20   : > { %s2265_s26 = scalar_select %p1978_p6, 1, 0 }
  0x21   : > { %p1439_p9 = pneg %p1986_p8  ;;  %s374_s13 = sshll.u32 %s1868_s12, 4  ;;  %s375_s13 = int_to_ptr.vmem [resolvable:$true] %s374_s13 }
  0x22   : > { %2266 = sst [smem:[#allocation29_spill]] %s2265_s26  ;;  %p1226_p11 = scmp.ge.s32.totalorder %s1866_s22, 2 }
  0x23   : > { %p1994_p10 = pnand %p1439_p9, %p95_p1  ;;  %s2236_s15 = smov 64  }
  0x24   : > { %s372_s29 = sshll.u32 %s2267_s6, 4  ;;  %s2238_s16 = smov 4   ;;  %s373_s29 = int_to_ptr.hbm [resolvable:$true] %s372_s29 }
  0x25   : > { %1445 = dma.hbm_to_vmem [thread:$0]  (!%p1994_p10), %s373_s29, 1024, %s375_s13, [#allocation11], %s2236_s15, %s2236_s15, %s2238_s16  }
  0x26   : > { %s51_s24 = sadd.s32 1, %s1862_s21  ;;  %s81_s27 = sadd.s32 1, %s1854_s19 }
  0x27   : > { %p53_p12 = scmp.ge.s32.totalorder %s51_s24, 2  ;;  %p88_p13 = scmp.ne.s32.totalorder %s1854_s19, %s1850_s18 }
  0x28   : > { %p89_p0 = scmp.eq.s32.totalorder %s1866_s22, 0  ;;  %p1472_p7 = scmp.lt.s32.totalorder %s1866_s22, 2 }
  0x29   : > { %s2298_s24 = smov (%p53_p12, %s51_s24), 0  ;;  %p2013_p5 = por %p310_p2, %p88_p13 }
  0x2a   : > { %2270 = sst [smem:[#allocation30_spill]] %s2298_s24  ;;  %p90_p3 = por %p89_p0, %p88_p13 }
  0x2b   : > { %s2271_s28 = scalar_select %p2013_p5, 1, 0 }
  0x2c   : > { %s76_s12 = ssub.s32 %s1862_s21, %s2298_s24  ;;  %s2021_s29 = sand.u32 1, %s1854_s19  }
  0x2d   : > { %2272 = sst [smem:[#allocation31_spill]] %s2271_s28  ;;  %p79_p9 = scmp.eq.s32.totalorder %s76_s12, 0 }
  0x2e   : > { %s2248_s13 = sshll.u32 %s2021_s29, 2  ;;  %s2250_s15 = sshll.u32 %s1862_s21, 2 }
  0x2f   : > { %s2026_s16 = scalar_select %p79_p9, %s1854_s19, %s81_s27  }
  0x30   : > { %p2028_p12 = pnand %p1472_p7, %p90_p3  ;;  %s2249_s26 = sand.u32 1, %s1866_s22  }
  0x31   : > { %2273 = sst [smem:[#allocation32_spill]] %s2026_s16  ;;  %s432_s9 = scalar_lea.vmem [#allocation7], %s2248_s13 }
  0x32   : > { %s2275_s2 = sld [smem:[#allocation34_spill]]  ;;  %s441_s11 = sshll.u32 %s432_s9, 4  ;;  %s442_s11 = int_to_ptr.vmem [resolvable:$true] %s441_s11 }
  0x33   : > { %s2042_s27 = scalar_lea.sflag [#allocation8], %s2249_s26  ;;  %s1231_s16 = sshll.u32 %s2021_s29, 6 }
  0x34   : > { %s1381_s19 = sshll.u32 %s1862_s21, 6  ;;  %s452_s28 = scalar_lea.vmem [#allocation9], %s1231_s16 }
  0x35   : > { %s460_s17 = sshll.u32 %s452_s28, 4  ;;  %s474_s24 = scalar_lea.vmem [#allocation10], %s1231_s16  ;;  %s2049_s17 = int_to_ptr.vmem [resolvable:$true] %s460_s17 }
  0x36   : > { %s482_s9 = sshll.u32 %s474_s24, 4  ;;  %s2276_s0 = sld [smem:[#allocation33_spill]]  ;;  %s2051_s9 = int_to_ptr.vmem [resolvable:$true] %s482_s9 }
  0x37   : > { %s2277_s8 = sld [smem:[#allocation38_spill]]  ;;  %s2278_s24 = smov 4  }
  0x38   : > { %s437_s12 = scalar_lea.hbm %s2275_s2, %s2250_s15  ;;  %s1872_s2 = smov [#allocation13]  }
  0x39   : > { %s439_s10 = sshll.u32 %s437_s12, 4  ;;  %s391_s16 = sshll.u32 %s1872_s2, 4  ;;  %s440_s10 = int_to_ptr.hbm [resolvable:$true] %s439_s10  ;;  %s392_s16 = int_to_ptr.vmem [resolvable:$true] %s391_s16 }
  0x3a   : > { %1455 = dma.hbm_to_vmem [thread:$0]  (!%p2028_p12), %s440_s10, 64, %s442_s11, %s2042_s27  }
  0x3b   : > { %s1871_s10 = smov [#allocation2]   ;;  %s2279_s7 = smov 64  }
  0x3c   : > { %s363_s26 = sshll.u32 %s2276_s0, 4  ;;  %s2280_s13 = sshll.u32 %s1862_s21, 2  ;;  %s364_s26 = int_to_ptr.hbm [resolvable:$true] %s363_s26 }
  0x3d   : > { %1442 = dma.hbm_to_smem (!%p1994_p10), %s364_s26, 16, %s1871_s10, [#allocation5]  }
  0x3e   : > { %s389_s28 = sshll.u32 %s2277_s8, 4  ;;  %s417_s26 = scalar_lea.hbm %s2225_s1, %s2280_s13  ;;  %s390_s28 = int_to_ptr.hbm [resolvable:$true] %s389_s28 }
  0x3f   : > { %1448 = dma.hbm_to_vmem [thread:$0]  (!%p1994_p10), %s390_s28, 1024, %s392_s16, [#allocation14], %s2279_s7, %s2279_s7, %s2278_s24  }
  0x40   : > { %s419_s15 = sshll.u32 %s417_s26, 4  ;;  %s2281_s10 = sshll.u32 %s2021_s29, 2  ;;  %s420_s15 = int_to_ptr.hbm [resolvable:$true] %s419_s15 }
  0x41   : > { %s412_s2 = scalar_lea.vmem [#allocation6], %s2281_s10  ;;  %s409_s14 = scalar_lea.sflag [#allocation3], %s2021_s29 }
  0x42   : > { %s421_s11 = sshll.u32 %s412_s2, 4  ;;  %s457_s28 = scalar_lea.hbm %s2227_s3, %s1381_s19  ;;  %s422_s11 = int_to_ptr.vmem [resolvable:$true] %s421_s11 }
  0x43   : > { %1452 = dma.hbm_to_vmem [thread:$0]  (!%p2028_p12), %s420_s15, 64, %s422_s11, %s409_s14  }
  0x44   : > { %s479_s0 = scalar_lea.hbm %s2228_s4, %s1381_s19  ;;  %s458_s13 = sshll.u32 %s457_s28, 4  ;;  %s459_s13 = int_to_ptr.hbm [resolvable:$true] %s458_s13 }
  0x45   : > { %s480_s12 = sshll.u32 %s479_s0, 4  ;;  %s2282_s29 = sand.u32 1, %s1866_s22   ;;  %s481_s12 = int_to_ptr.hbm [resolvable:$true] %s480_s12 }
  0x46   : > { %1458 = dma.hbm_to_vmem [thread:$0]  (!%p2028_p12), %s459_s13, 1024, %s2049_s17, %s2042_s27, %s2279_s7, %s2279_s7, %s2278_s24  }
  0x47   : > { %s471_s26 = scalar_lea.sflag [#allocation11], %s2282_s29  ;;  %500 = sbr.rel (%p1986_p8) target bundleno = 917 (0x395), region = 60 }
  0x48   : > { %1461 = dma.hbm_to_vmem [thread:$0]  (!%p2028_p12), %s481_s12, 1024, %s2051_s9, %s471_s26, %s2279_s7, %s2279_s7, %s2278_s24  }
  0x4c   : > { %1813 = dma.done.wait (%p95_p1), [#allocation5], 16  }
  0x4d   : > { %1815 = vsyncadd (%p95_p1), [#allocation5], 4294967280  ;;  %s2104_s5 = sand.u32 1, %s1850_s18  }
  0x4e   : > { %s2107_s6 = sshll.u32 %s2104_s5, 2  ;;  %s508_s8 = scalar_lea.sflag [#allocation3], %s2104_s5 }
  0x4f   : > { %s511_s7 = scalar_lea.vmem [#allocation6], %s2107_s6 }
  0x50   : > { %1817 = dma.done.wait (%p1973_p4), %s508_s8, 64  }
  0x51   : > { %1819 = vsyncadd (%p1973_p4), %s508_s8, 4294967232  ;;  %s517_s19 = sand.u32 1, %s1964_s23   ;;  %s521_s30 = scalar_lea.vmem [#allocation7], %s2107_s6 }
  0x52   : > { %s518_s21 = scalar_lea.sflag [#allocation8], %s517_s19 }
  0x53   : > { %1821 = dma.done.wait (%p1973_p4), %s518_s21, 1088  }
  0x54   : > { %1823 = vsyncadd (%p1973_p4), %s518_s21, 4294966208  ;;  %s1241_s27 = sshll.u32 %s2104_s5, 6  ;;  %s538_s9 = scalar_lea.sflag [#allocation11], %s517_s19 }
  0x55   : > { %s2122_s17 = scalar_lea.vmem [#allocation9], %s1241_s27  ;;  %s2124_s24 = scalar_lea.vmem [#allocation10], %s1241_s27 }
  0x56   : > { %1825 = dma.done.wait (%p1973_p4), %s538_s9, 1024  }
  0x57   : > { %1827 = vsyncadd (%p1973_p4), %s538_s9, 4294966272 }
  0x58   : > { %1829 = dma.done.wait (%p95_p1), [#allocation11], 1024  }
  0x59   : > { %1831 = vsyncadd (%p95_p1), [#allocation11], 4294966272 }
  0x5a   : > { %1833 = dma.done.wait (%p95_p1), [#allocation14], 1024  }
  0x5b   : > { %1835 = vsyncadd (%p95_p1), [#allocation14], 4294966272 }
  0x5c   : > { %557 = sfence }
  0x5d   : > { %v1390_v0 = vld [vmem:[#allocation12 + $0x38] sm:$0xff]  ;;  %v1389_v1 = vld [vmem:[#allocation12 + $0x30] sm:$0xff]  ;;  %v1388_v4 = vld [vmem:[#allocation12 + $0x28] sm:$0xff]  ;;  %p615_p1 = scmp.lt.s32.totalorder %s1858_s20, 1  ;;  %s2283_s10 = sld [smem:[#allocation35_spill]] }
  0x5e   : > { %688 = vmatpush.bf16.msra.mxu0 %v1390_v0  ;;  %v1398_v2 = vld [vmem:[%s2122_s17 + $0x38] sm:$0xff]  ;;  %v1397_v3 = vld [vmem:[%s2122_s17 + $0x30] sm:$0xff]  ;;  %v1396_v5 = vld [vmem:[%s2122_s17 + $0x28] sm:$0xff]  ;;  %s2284_s28 = sld [smem:[#allocation37_spill]]  ;;  %s614_s16 = scalar_lea.vmem [#allocation16], %s2107_s6 }
  0x5f   : > { %774 = vmatpush.bf16.msra.mxu1 %v1398_v2  ;;  %v1387_v6 = vld [vmem:[#allocation12 + $0x20] sm:$0xff]  ;;  %v1386_v8 = vld [vmem:[#allocation12 + $0x18] sm:$0xff]  ;;  %v1385_v10 = vld [vmem:[#allocation12 + $0x10] sm:$0xff]  ;;  %s616_s23 = scalar_select %p615_p1, %s1858_s20, 1 }
  0x60   : > { %v1395_v7 = vld [vmem:[%s2122_s17 + $0x20] sm:$0xff]  ;;  %v1394_v9 = vld [vmem:[%s2122_s17 + $0x18] sm:$0xff]  ;;  %v1393_v11 = vld [vmem:[%s2122_s17 + $0x10] sm:$0xff]  ;;  %s1377_s13 = sshll.u32 %s1858_s20, 2  ;;  %s2286_s26 = sld [smem:[#allocation41_spill]] }
  0x61   : > { %v1384_v12 = vld [vmem:[#allocation12 + $0x8] sm:$0xff]  ;;  %v1383_v13 = vld [vmem:[#allocation12] sm:$0xff]  ;;  %v619_v14 = vld [vmem:[%s511_s7] sm:$0xf]  ;;  %s996_s7 = sshll.u32 %s614_s16, 4  ;;  %s968_s21 = scalar_lea.sflag [#allocation17], %s2104_s5  ;;  %s997_s7 = int_to_ptr.vmem [resolvable:$true] %s996_s7 }
  0x62   : > { %689 = vmatpush.bf16.msra.mxu0 %v1389_v1  ;;  %v1392_v15 = vld [vmem:[%s2122_s17 + $0x8] sm:$0xff]  ;;  %v1391_v16 = vld [vmem:[%s2122_s17] sm:$0xff]  ;;  %v701_v17 = vld [vmem:[%s521_s30] sm:$0xf] }
  0x63   : > { %775 = vmatpush.bf16.msra.mxu1 %v1397_v3  ;;  %s617_s2 = scalar_lea.vmem %s2283_s10, %s616_s23  ;;  %v702_v19 = vunpack.c.l.bf16 %v701_v17  ;;  %v1406_v30 = vld [vmem:[%s2124_s24 + $0x38] sm:$0xff]  ;;  %v1405_v31 = vld [vmem:[%s2124_s24 + $0x30] sm:$0xff]  ;;  %v1404_v32 = vld [vmem:[%s2124_s24 + $0x28] sm:$0xff] }
  0x64   : > { %v1530_v18 = vld [vmem:[%s2284_s28] ss:$0 sm:$0xff]  ;;  %862 = vmatpush.bf16.msra.mxu2 %v1406_v30  ;;  %v1403_v33 = vld [vmem:[%s2124_s24 + $0x20] sm:$0xff]  ;;  %v1402_v34 = vld [vmem:[%s2124_s24 + $0x18] sm:$0xff] }
  0x65   : > { %v1531_v26 = vld [vmem:[%s617_s2] ss:$0 sm:$0xff]  ;;  %v1400_v40 = vld [vmem:[%s2124_s24 + $0x8] sm:$0xff]  ;;  %v1399_v41 = vld [vmem:[%s2124_s24] sm:$0xff] }
  0x66   : > { %690 = vmatpush.bf16.msra.mxu0 %v1388_v4  ;;  %v1401_v39 = vld [vmem:[%s2124_s24 + $0x10] sm:$0xff]  ;;  %v1414_v42 = vld [vmem:[#allocation13 + $0x38] sm:$0xff]  ;;  %v1412_v44 = vld [vmem:[#allocation13 + $0x28] sm:$0xff]  ;;  %s994_s8 = scalar_lea.hbm %s2286_s26, %s1377_s13  ;;  %s1752_s24 = scalar_lea.hbm %s2286_s26, 8 }
  0x67   : > { %776 = vmatpush.bf16.msra.mxu1 %v1396_v5  ;;  %940 = vmatpush.bf16.msra.mxu3 %v1414_v42  ;;  %v1413_v43 = vld [vmem:[#allocation13 + $0x30] sm:$0xff]  ;;  %v1411_v45 = vld [vmem:[#allocation13 + $0x20] sm:$0xff]  ;;  %v1410_v46 = vld [vmem:[#allocation13 + $0x18] sm:$0xff]  ;;  %s998_s19 = sshll.u32 %s994_s8, 4  ;;  %s999_s19 = int_to_ptr.hbm [resolvable:$true] %s998_s19 }
  0x68   : > { %863 = vmatpush.bf16.msra.mxu2 %v1405_v31  ;;  %v1409_v47 = vld [vmem:[#allocation13 + $0x10] sm:$0xff]  ;;  %v1408_v49 = vld [vmem:[#allocation13 + $0x8] sm:$0xff]  ;;  %v1407_v53 = vld [vmem:[#allocation13] sm:$0xff]  ;;  %s1746_s30 = sshra.s32 %s999_s19, 4  ;;  %s1747_s30 = int_to_ptr.hbm [resolvable:$true] %s1746_s30 }
  0x69   : > { %s1748_s27 = scalar_lea.hbm %s1747_s30, 4  ;;  %p1753_p10 = scmp.lt.s32.totalorder %s1747_s30, %s2286_s26 }
  0x6a   : > { %691 = vmatpush.bf16.msra.mxu0 %v1387_v6  ;;  %p1749_p2 = scmp.ne.s32.totalorder %s1747_s30, %s1748_s27  ;;  %p1754_p13 = scmp.lt.s32.totalorder %s1752_s24, %s1748_s27 }
  0x6b   : > { %777 = vmatpush.bf16.msra.mxu1 %v1395_v7  ;;  %941 = vmatpush.bf16.msra.mxu3 %v1413_v43 }
  0x6c   : > { %864 = vmatpush.bf16.msra.mxu2 %v1404_v32  ;;  %p1750_p4 = pnand %p1749_p2, %p2013_p5  ;;  %p1755_p0 = por %p1754_p13, %p1753_p10 }
  0x6e   : > { %692 = vmatpush.bf16.msra.mxu0 %v1386_v8  ;;  %p1751_p8 = pneg %p1750_p4 }
  0x6f   : > { %778 = vmatpush.bf16.msra.mxu1 %v1394_v9  ;;  %942 = vmatpush.bf16.msra.mxu3 %v1412_v44 }
  0x70   : > { %865 = vmatpush.bf16.msra.mxu2 %v1403_v33  ;;  %p1756_p3 = pnand %p1755_p0, %p1751_p8 }
  0x72   : > { %693 = vmatpush.bf16.msra.mxu0 %v1385_v10 }
  0x73   : > { %779 = vmatpush.bf16.msra.mxu1 %v1393_v11  ;;  %943 = vmatpush.bf16.msra.mxu3 %v1411_v45 }
  0x74   : > { %866 = vmatpush.bf16.msra.mxu2 %v1402_v34 }
  0x76   : > { %694 = vmatpush.bf16.msra.mxu0 %v1384_v12 }
  0x77   : > { %780 = vmatpush.bf16.msra.mxu1 %v1392_v15  ;;  %944 = vmatpush.bf16.msra.mxu3 %v1410_v46 }
  0x78   : > { %867 = vmatpush.bf16.msra.mxu2 %v1401_v39 }
  0x7a   : > { %695 = vmatpush.bf16.msra.mxu0 %v1383_v13 }
  0x7b   : > { %781 = vmatpush.bf16.msra.mxu1 %v1391_v16  ;;  %945 = vmatpush.bf16.msra.mxu3 %v1409_v47 }
  0x7c   : > { %868 = vmatpush.bf16.msra.mxu2 %v1400_v40 }
  0x7d   : > { %696 = vmatmul.bf16.vlgmr.msra.gmra.mxu0 %v619_v14 }
  0x7f   : > { %946 = vmatpush.bf16.msra.mxu3 %v1408_v49 }
  0x80   : > { %869 = vmatpush.bf16.msra.mxu2 %v1399_v41 }
  0x83   : > { %947 = vmatpush.bf16.msra.mxu3 %v1407_v53 }
  0xfa   : > { %v697_v20 = vpop.f32.mrf.mxu0 }
  0xfb   : > { %v698_v21 = vadd.f32 %v1530_v18, %v697_v20 }
  0xfd   : > { %v703_v22 = vadd.f32 %v702_v19, %v698_v21 }
  0xff   : > { %v704_v23 = vmul.f32 0.70710677, %v703_v22 }
 0x101   : > { %v705_v24 = vpack.c.bf16 %v704_v23, %v704_v23 }
 0x102   : > { %v699_v25 = vpop.f32.mrf.mxu0 }
 0x103   : > { %782 = vmatmul.bf16.vlgmr.msra.gmra.mxu1 %v705_v24 }
 0x180   : > { %v783_v27 = vpop.f32.mrf.mxu1 }
 0x181   : > { %v784_v28 = vadd.f32 %v1531_v26, %v783_v27 }
 0x183   : > { %787 = vmax.xlane.f32.xlu0 %v784_v28 }
 0x188   : > { %v785_v29 = vpop.f32.mrf.mxu1 }
 0x1f6   : > { %v788_v35 = vpop.xlane.xlu0 %787 }
 0x1f7   : > { %v789_v36 = vsub.f32 %v784_v28, %v788_v35 }
 0x1f9   : > { %v790_v37 = vmul.f32 1.442695, %v789_v36 }
 0x1fb   : > { %1533 = vpow2.f32 %v790_v37 }
 0x201   : > { %v1534_v38 = vpop.eup %1533 }
 0x202   : > { %792 = vadd.xlane.f32.xlu0 %v1534_v38 }
 0x275   : > { %v793_v48 = vpop.xlane.xlu0 %792 }
 0x276   : > { %1535 = vrcp.f32 %v793_v48 }
 0x27c   : > { %v1536_v50 = vpop.eup %1535 }
 0x27d   : > { %v795_v51 = vmul.f32 %v1536_v50, %v1534_v38 }
 0x27f   : > { %v796_v52 = vpack.c.bf16 %v795_v51, %v795_v51 }
 0x281   : > { %870 = vmatmul.bf16.vlgmr.msra.gmra.mxu2 %v796_v52  ;;  %797 = vst [vmem:[%s614_s16] sm:$0xf] %v796_v52 }
 0x304   : > { %v871_v54 = vpop.f32.mrf.mxu2 }
 0x305   : > { %v875_v55 = vpack.c.bf16 %v871_v54, %v871_v54 }
 0x307   : > { %948 = vmatmul.bf16.vlgmr.msra.gmra.mxu3 %v875_v55 }
 0x30c   : > { %v873_v56 = vpop.f32.mrf.mxu2 }
 0x30d   : > { %1759 = shalt.err (!%p1756_p3)
}
 0x30e   : > { %1436 = dma.vmem_to_hbm [thread:$0]  (%p2013_p5), %s997_s7, 64, %s999_s19, %s968_s21  }
 0x30f   : > { %s618_s15 = sld [smem:[#allocation2 + %s1858_s20]]  ;;  %s607_s29 = scalar_lea.vmem [#allocation15], %s2107_s6 }
 0x310   : > { %s2287_s11 = sld [smem:[#allocation39_spill]]  ;;  %s981_s8 = sshll.u32 %s607_s29, 4  ;;  %s982_s8 = int_to_ptr.vmem [resolvable:$true] %s981_s8 }
 0x311   : > { %s2288_s16 = sld [smem:[#allocation40_spill]]  ;;  %s963_s20 = scalar_lea.sflag [#allocation4], %s2104_s5 }
 0x315   : > { %v953_v57 = vstv %s618_s15 }
 0x316   : > { %v1532_v58 = vld [vmem:[%s2287_s11] ss:$0 sm:$0xff] }
 0x317   : > { %s979_s12 = scalar_lea.hbm %s2288_s16, %s1377_s13  ;;  %s1780_s6 = scalar_lea.hbm %s2288_s16, 8 }
 0x318   : > { %s983_s30 = sshll.u32 %s979_s12, 4  ;;  %s984_s30 = int_to_ptr.hbm [resolvable:$true] %s983_s30 }
 0x319   : > { %s1774_s7 = sshra.s32 %s984_s30, 4  ;;  %s1775_s7 = int_to_ptr.hbm [resolvable:$true] %s1774_s7 }
 0x31a   : > { %s1776_s19 = scalar_lea.hbm %s1775_s7, 4  ;;  %p1781_p1 = scmp.lt.s32.totalorder %s1775_s7, %s2288_s16 }
 0x31b   : > { %p1777_p7 = scmp.ne.s32.totalorder %s1775_s7, %s1776_s19  ;;  %p1782_p2 = scmp.lt.s32.totalorder %s1780_s6, %s1776_s19 }
 0x31d   : > { %p1778_p9 = pnand %p1777_p7, %p2013_p5  ;;  %p1783_p4 = por %p1782_p2, %p1781_p1 }
 0x31f   : > { %p1779_p12 = pneg %p1778_p9 }
 0x321   : > { %p1784_p8 = pnand %p1783_p4, %p1779_p12 }
 0x38a   : > { %v949_v59 = vpop.f32.mrf.mxu3 }
 0x38b   : > { %v954_v60 = vmul.f32 %v953_v57, %v949_v59 }
 0x38d   : > { %v959_v61 = vadd.f32 %v1532_v58, %v954_v60 }
 0x38f   : > { %v960_v62 = vpack.c.bf16 %v959_v61, %v959_v61 }
 0x391   : > { %961 = vst [vmem:[%s607_s29] sm:$0xf] %v960_v62 }
 0x392   : > { %v951_v63 = vpop.f32.mrf.mxu3 }
 0x393   : > { %1787 = shalt.err (!%p1784_p8)
}
 0x394   : > { %1435 = dma.vmem_to_hbm [thread:$0]  (%p2013_p5), %s982_s8, 64, %s984_s30, %s963_s20  }
 0x395 PF: > { %s2289_s5 = sld [smem:[#allocation26_spill]]  ;;  %p1463_p10 = pnand %p1226_p11, %p1978_p6 }
 0x397   : > { %p1464_p13 = pneg %p1463_p10 }
 0x39b   : > { %s1010_s24 = sand.u32 1, %s2289_s5  }
 0x39c   : > { %s1011_s23 = scalar_lea.sflag [#allocation4], %s1010_s24 }
 0x39d   : > { %1837 = dma.done.wait (%p1464_p13), %s1011_s23, 64  }
 0x39e   : > { %1839 = vsyncadd (%p1464_p13), %s1011_s23, 4294967232  ;;  %s1021_s25 = scalar_lea.sflag [#allocation17], %s1010_s24 }
 0x39f   : > { %1841 = dma.done.wait (%p1464_p13), %s1021_s25, 64  }
 0x3a0   : > { %1843 = vsyncadd (%p1464_p13), %s1021_s25, 4294967232  ;;  %s39_s22 = sadd.s32 1, %s1866_s22   ;;  %s2291_s0 = sld [smem:[#allocation27_spill]] }
 0x3a1   : > { %p36_p0 = scmp.ge.s32.totalorder %s39_s22, 4   ;;  %s2292_s19 = sld [smem:[#allocation32_spill]] }
 0x3a2   : > { %s2293_s20 = sld [smem:[#allocation28_spill]]  ;;  %s2295_s17 = smov %s1850_s18 }
 0x3a3   : > { %s2294_s21 = sld [smem:[#allocation30_spill]]  ;;  %38 = sbr.rel (!%p36_p0) target bundleno = 24 (0x18), region = 175 }
 0x3a6   : > { %s2296_s18 = smov %s2291_s0 }
 0x3a8   :  { %1027 = vsyncpa [#allocation3], 1 }
 0x3a9   :  { %1029 = vsyncpa [#allocation3 + $0x1], 1 }
 0x3aa   :  { %1030 = vsyncpa [#allocation8], 1 }
 0x3ab   :  { %1032 = vsyncpa [#allocation8 + $0x1], 1 }
 0x3ac   :  { %1033 = vsyncpa [#allocation11], 1 }
 0x3ad   :  { %1035 = vsyncpa [#allocation11 + $0x1], 1 }
 0x3ae   :  { %1036 = vsyncpa [#allocation14], 1 }
 0x3af   :  { %1037 = vsyncpa [#allocation4], 1 }
 0x3b0   :  { %1039 = vsyncpa [#allocation4 + $0x1], 1 }
 0x3b1   :  { %1040 = vsyncpa [#allocation17], 1 }
 0x3b2   :  { %1042 = vsyncpa [#allocation17 + $0x1], 1 }
 0x3b3   :  { %1043 = vsyncpa [#allocation5], 1 }
 0x3b4   :  { %1045 = vsyncpa [#allocation5 + $0x1], 1 }

</bundles_post_ra>
